<compile_context>
chip_gen: v6e
topology: v6e:2x2x1
jax: 0.10.0
libtpu: 0.0.40
codegen_flags: <defaults>
</compile_context>

<pallas_src>
import functools

import jax
import jax.numpy as jnp
from jax.experimental import pallas as pl
from jax.experimental.pallas import tpu as pltpu


_MISH_CLAMP = 20.0


def _mish(x):
    # mish(x) = x * tanh(softplus(x)) = x * (e^2 + 2e) / (e^2 + 2e + 2), e = exp(x)
    # Single exp (EUP) + approx EUP reciprocal + one VPU Newton step.
    # The clamp keeps exp finite for padded garbage rows; mish(x) == x for x > 20
    # to f32 precision anyway.  All math in f32 (v5e has no bf16 VPU/EUP).
    e = jnp.exp(jnp.minimum(x, _MISH_CLAMP))
    num = e * (e + 2.0)
    den = num + 2.0
    r = pl.reciprocal(den, approx=True)
    r = r * (2.0 - den * r)                 # Newton step -> ~f32 accuracy
    return jnp.where(x > _MISH_CLAMP, x, x * (num * r))


def _critic_kernel_split(state_ref, action_ref, w1s_ref, w1a_ref,
                         w2a_ref, w2b_ref, w3a_ref, w3b_ref, w4_ref,
                         b_ref, out_ref):
    """Fast path: H % 128 == 0, per-net (H, H) weights, no zero blocks."""
    H = w2a_ref.shape[0]
    b = b_ref[...]                                            # (4, 2H) f32 bias slab
    # Layer 1 (fused across both Q nets): implicit concat via two bf16 dots.
    h = jnp.dot(state_ref[...], w1s_ref[...], preferred_element_type=jnp.float32)
    h = h + jnp.dot(action_ref[...], w1a_ref[...],
                    preferred_element_type=jnp.float32)
    h = _mish(h + b[0:1, :])                                  # (tb, 2H) f32
    # Lane-aligned split (H multiple of 128) into the two Q-net streams.
    h1 = h[:, :H].astype(jnp.bfloat16)
    h2 = h[:, H:].astype(jnp.bfloat16)
    # Layer 2.
    h1 = _mish(jnp.dot(h1, w2a_ref[...], preferred_element_type=jnp.float32)
               + b[1:2, :H])
    h2 = _mish(jnp.dot(h2, w2b_ref[...], preferred_element_type=jnp.float32)
               + b[1:2, H:])
    # Layer 3.
    h1 = _mish(jnp.dot(h1.astype(jnp.bfloat16), w3a_ref[...],
                       preferred_element_type=jnp.float32) + b[2:3, :H])
    h2 = _mish(jnp.dot(h2.astype(jnp.bfloat16), w3b_ref[...],
                       preferred_element_type=jnp.float32) + b[2:3, H:])
    # Layer 4: broadcast-mul + cross-lane reduce (XLU) instead of an MXU push
    # with only 1 useful output lane per Q-net.
    w4 = w4_ref[...].astype(jnp.float32)                      # (2, H)
    q1 = jnp.sum(h1 * w4[0:1, :], axis=-1, keepdims=True) + b[3:4, 0:1]
    q2 = jnp.sum(h2 * w4[1:2, :], axis=-1, keepdims=True) + b[3:4, 1:2]
    out_ref[:, 0:1] = q1.astype(out_ref.dtype)
    out_ref[:, 1:2] = q2.astype(out_ref.dtype)


def _critic_kernel_blockdiag(state_ref, action_ref, w1s_ref, w1a_ref,
                             w2_ref, w3_ref, w4_ref, b_ref, out_ref):
    """Fallback path for H % 128 != 0: block-diagonal fused (2H, 2H) weights."""
    b = b_ref[...]                                            # (4, 2H) f32
    h = jnp.dot(state_ref[...], w1s_ref[...], preferred_element_type=jnp.float32)
    h = h + jnp.dot(action_ref[...], w1a_ref[...],
                    preferred_element_type=jnp.float32)
    h = _mish(h + b[0:1, :])
    h = _mish(jnp.dot(h.astype(jnp.bfloat16), w2_ref[...],
                      preferred_element_type=jnp.float32) + b[1:2, :])
    h = _mish(jnp.dot(h.astype(jnp.bfloat16), w3_ref[...],
                      preferred_element_type=jnp.float32) + b[2:3, :])
    q = jnp.dot(h.astype(jnp.bfloat16), w4_ref[...],
                preferred_element_type=jnp.float32) + b[3:4, 0:2]
    out_ref[...] = q.astype(out_ref.dtype)


@functools.partial(jax.jit, static_argnames=("block_b", "min_grid_steps"))
def critic_forward(state, action, packed, *, block_b=1024, min_grid_steps=1):
    """Returns (q1, q2), each of shape (B, 1), matching Critic.forward."""
    B, SD = state.shape
    AD = action.shape[-1]
    H2 = packed["bias"].shape[1]                              # 2 * hidden_dim
    H = H2 // 2
    split = "w2a" in packed                                   # static (pytree structure)

    # Batch tile: big tiles amortise the ~0.35 us per-grid-step overhead; the
    # per-step working set (bf16 input blocks + (tb, 2H) f32 intermediates)
    # stays far below even v7x's 64 MiB VMEM at tb <= 2048.
    tb = min(block_b, B)
    if min_grid_steps > 1 and B > 8:
        # Pass min_grid_steps=2 on v7x so the "parallel" batch axis can shard
        # across its two TensorCores even when B <= block_b (no-op on v5e/v6e,
        # which only lose one extra grid step).
        per_step = -(-B // min_grid_steps)                    # ceil
        per_step = 8 * (-(-per_step // 8))                    # round up to sublanes
        tb = max(8, min(tb, per_step))
    grid = (pl.cdiv(B, tb),)

    # bf16 inputs: halves per-step HBM traffic and feeds the MXU fast path.
    state_c = state.astype(jnp.bfloat16)
    action_c = action.astype(jnp.bfloat16)

    def row_spec(shape):      # tiles over the batch axis
        return pl.BlockSpec(shape, lambda i: (i, 0))

    def rep_spec(shape):      # resident across all grid steps (weights / biases)
        return pl.BlockSpec(shape, lambda i: (0, 0))

    if split:
        kernel = _critic_kernel_split
        weight_args = (packed["w1s"], packed["w1a"], packed["w2a"], packed["w2b"],
                       packed["w3a"], packed["w3b"], packed["w4"], packed["bias"])
        weight_specs = [rep_spec((SD, H2)), rep_spec((AD, H2)),
                        rep_spec((H, H)), rep_spec((H, H)),
                        rep_spec((H, H)), rep_spec((H, H)),
                        rep_spec((2, H)), rep_spec((4, H2))]
        macs = (SD + AD) * H2 + 2 * 2 * H * H + H2
    else:
        kernel = _critic_kernel_blockdiag
        weight_args = (packed["w1s"], packed["w1a"], packed["w2"], packed["w3"],
                       packed["w4"], packed["bias"])
        weight_specs = [rep_spec((SD, H2)), rep_spec((AD, H2)),
                        rep_spec((H2, H2)), rep_spec((H2, H2)),
                        rep_spec((H2, 2)), rep_spec((4, H2))]
        macs = (SD + AD) * H2 + 2 * H2 * H2 + H2 * 2

    weight_bytes = sum(int(v.size) * v.dtype.itemsize for v in weight_args)
    cost = pl.CostEstimate(
        flops=2 * B * macs,
        transcendentals=2 * 3 * B * H2,                       # exp + recip per hidden act
        bytes_accessed=(B * (SD + AD) * state_c.dtype.itemsize
                        + B * 2 * 4 + weight_bytes),
    )

    out = pl.pallas_call(
        kernel,
        grid=grid,
        in_specs=[row_spec((tb, SD)), row_spec((tb, AD))] + weight_specs,
        out_specs=row_spec((tb, 2)),
        out_shape=jax.ShapeDtypeStruct((B, 2), jnp.float32),
        compiler_params=pltpu.CompilerParams(
            dimension_semantics=("parallel",)),
        cost_estimate=cost,
    )(state_c, action_c, *weight_args)

    return out[:, 0:1], out[:, 1:2]


def pack_critic_params(params, state_dim, *, weight_dtype=jnp.bfloat16):
    """One-time fusion/packing of the two Q-networks for the Pallas kernel."""
    H = params["w1a"].shape[1]
    w1 = jnp.concatenate([params["w1a"], params["w1b"]], axis=1)          # (D, 2H)
    bias = jnp.concatenate([
        jnp.concatenate([params["b1a"], params["b1b"]], axis=1),
        jnp.concatenate([params["b2a"], params["b2b"]], axis=1),
        jnp.concatenate([params["b3a"], params["b3b"]], axis=1),
        jnp.pad(jnp.concatenate([params["b4a"], params["b4b"]], axis=1),
                ((0, 0), (0, 2 * H - 2))),
    ], axis=0).astype(jnp.float32)                                        # (4, 2H)

    packed = {
        "w1s": w1[:state_dim].astype(weight_dtype),                       # (SD, 2H)
        "w1a": w1[state_dim:].astype(weight_dtype),                       # (AD, 2H)
        "bias": bias,
    }
    if H % 128 == 0:
        # Split path: per-net (H, H) weights, no zero blocks; w4 packed as rows.
        packed.update({
            "w2a": params["w2a"].astype(weight_dtype),
            "w2b": params["w2b"].astype(weight_dtype),
            "w3a": params["w3a"].astype(weight_dtype),
            "w3b": params["w3b"].astype(weight_dtype),
            "w4": jnp.concatenate([params["w4a"].T, params["w4b"].T],
                                  axis=0).astype(weight_dtype),           # (2, H)
        })
    else:
        # Fallback: block-diagonal fusion (lane-misaligned split otherwise).
        z = jnp.zeros((H, H), jnp.float32)
        z1 = jnp.zeros((H, 1), jnp.float32)
        packed.update({
            "w2": jnp.block([[params["w2a"], z],
                             [z, params["w2b"]]]).astype(weight_dtype),   # (2H, 2H)
            "w3": jnp.block([[params["w3a"], z],
                             [z, params["w3b"]]]).astype(weight_dtype),   # (2H, 2H)
            "w4": jnp.block([[params["w4a"], z1],
                             [z1, params["w4b"]]]).astype(weight_dtype),  # (2H, 2)
        })
    return packed


def init_critic_params(key, state_dim, action_dim, hidden_dim):
    """Deterministic init mimicking nn.Linear default (uniform(-1/sqrt(in), 1/sqrt(in)))."""
    in_dim = state_dim + action_dim
    dims = [(in_dim, hidden_dim), (hidden_dim, hidden_dim),
            (hidden_dim, hidden_dim), (hidden_dim, 1)]
    params = {}
    for net in ("a", "b"):
        for li, (din, dout) in enumerate(dims, start=1):
            key, kw, kb = jax.random.split(key, 3)
            bound = 1.0 / jnp.sqrt(float(din))
            params[f"w{li}{net}"] = jax.random.uniform(
                kw, (din, dout), jnp.float32, -bound, bound)
            params[f"b{li}{net}"] = jax.random.uniform(
                kb, (1, dout), jnp.float32, -bound, bound)
    return params


def _reference_forward(state, action, params):
    x = jnp.concatenate([state, action], axis=-1)

    def mish(v):
        return v * jnp.tanh(jax.nn.softplus(v))

    def mlp(net):
        h = mish(x @ params[f"w1{net}"] + params[f"b1{net}"])
        h = mish(h @ params[f"w2{net}"] + params[f"b2{net}"])
        h = mish(h @ params[f"w3{net}"] + params[f"b3{net}"])
        return h @ params[f"w4{net}"] + params[f"b4{net}"]

    return mlp("a"), mlp("b")


def _run_case(key, state_dim, action_dim, hidden_dim, batch, atol):
    kp, ks, ka = jax.random.split(key, 3)
    params = init_critic_params(kp, state_dim, action_dim, hidden_dim)
    packed = pack_critic_params(params, state_dim)

    state = jax.random.normal(ks, (batch, state_dim), jnp.float32)
    action = jax.random.normal(ka, (batch, action_dim), jnp.float32)

    q1, q2 = critic_forward(state, action, packed)
    jax.block_until_ready((q1, q2))

    r1, r2 = _reference_forward(state, action, params)
    assert q1.shape == (batch, 1) and q2.shape == (batch, 1)
    # bf16 MXU operands with f32 accumulation -> loosened tolerance vs f32 ref.
    assert jnp.allclose(q1, r1, atol=atol, rtol=atol), float(jnp.abs(q1 - r1).max())
    assert jnp.allclose(q2, r2, atol=atol, rtol=atol), float(jnp.abs(q2 - r2).max())


if __name__ == "__main__":
    key = jax.random.PRNGKey(0)
    k1, k2 = jax.random.split(key)

    # Small hidden dim -> block-diagonal fallback path.
    _run_case(k1, state_dim=16, action_dim=8, hidden_dim=32, batch=8, atol=2e-2)
    # Hidden dim multiple of 128 -> split (zero-block-free) fast path.
    _run_case(k2, state_dim=16, action_dim=8, hidden_dim=128, batch=8, atol=2e-2)

    print("KERNEL_OK")
</pallas_src>

<mosaic_0001>
module attributes {stable_mosaic.version = 11 : i64} {
  func.func @_critic_kernel_blockdiag(%arg0: i32, %arg1: memref<8x16xbf16, #tpu.memory_space<vmem>>, %arg2: memref<8x8xbf16, #tpu.memory_space<vmem>>, %arg3: memref<16x64xbf16, #tpu.memory_space<vmem>>, %arg4: memref<8x64xbf16, #tpu.memory_space<vmem>>, %arg5: memref<64x64xbf16, #tpu.memory_space<vmem>>, %arg6: memref<64x64xbf16, #tpu.memory_space<vmem>>, %arg7: memref<64x2xbf16, #tpu.memory_space<vmem>>, %arg8: memref<4x64xf32, #tpu.memory_space<vmem>>, %arg9: memref<8x2xf32, #tpu.memory_space<vmem>>) attributes {dimension_semantics = [#tpu.dimension_semantics<parallel>], iteration_bounds = array<i64: 1>, scalar_prefetch = 0 : i64, scratch_operands = 0 : i64, tpu.core_type = #tpu.core_type<tc>, window_params = [{transform_indices = @transform_0, window_bounds = array<i64: 8, 16>}, {transform_indices = @transform_1, window_bounds = array<i64: 8, 8>}, {pipeline_mode = #tpu.pipeline_mode<synchronous>, transform_indices = @transform_2, window_bounds = array<i64: 16, 64>}, {pipeline_mode = #tpu.pipeline_mode<synchronous>, transform_indices = @transform_3, window_bounds = array<i64: 8, 64>}, {pipeline_mode = #tpu.pipeline_mode<synchronous>, transform_indices = @transform_4, window_bounds = array<i64: 64, 64>}, {pipeline_mode = #tpu.pipeline_mode<synchronous>, transform_indices = @transform_5, window_bounds = array<i64: 64, 64>}, {pipeline_mode = #tpu.pipeline_mode<synchronous>, transform_indices = @transform_6, window_bounds = array<i64: 64, 2>}, {pipeline_mode = #tpu.pipeline_mode<synchronous>, transform_indices = @transform_7, window_bounds = array<i64: 4, 64>}, {transform_indices = @transform_8, window_bounds = array<i64: 8, 2>}]} {
    %c0 = arith.constant 0 : index
    %c0_0 = arith.constant 0 : index
    %0 = vector.load %arg8[%c0, %c0_0] : memref<4x64xf32, #tpu.memory_space<vmem>>, vector<4x64xf32>
    %c0_1 = arith.constant 0 : index
    %c0_2 = arith.constant 0 : index
    %1 = vector.load %arg1[%c0_1, %c0_2] : memref<8x16xbf16, #tpu.memory_space<vmem>>, vector<8x16xbf16>
    %c0_3 = arith.constant 0 : index
    %c0_4 = arith.constant 0 : index
    %2 = vector.load %arg3[%c0_3, %c0_4] : memref<16x64xbf16, #tpu.memory_space<vmem>>, vector<16x64xbf16>
    %cst = arith.constant dense<0.000000e+00> : vector<8x64xf32>
    %3 = tpu.matmul %1, %2, %cst {dimension_numbers = #tpu.dot_dimension_numbers<[1], [0], [0], [1], [0, 0, 1, 1], [], []>} : vector<8x16xbf16>, vector<16x64xbf16>, vector<8x64xf32> -> vector<8x64xf32>
    %c0_5 = arith.constant 0 : index
    %c0_6 = arith.constant 0 : index
    %4 = vector.load %arg2[%c0_5, %c0_6] : memref<8x8xbf16, #tpu.memory_space<vmem>>, vector<8x8xbf16>
    %c0_7 = arith.constant 0 : index
    %c0_8 = arith.constant 0 : index
    %5 = vector.load %arg4[%c0_7, %c0_8] : memref<8x64xbf16, #tpu.memory_space<vmem>>, vector<8x64xbf16>
    %cst_9 = arith.constant dense<0.000000e+00> : vector<8x64xf32>
    %6 = tpu.matmul %4, %5, %cst_9 {dimension_numbers = #tpu.dot_dimension_numbers<[1], [0], [0], [1], [0, 0, 1, 1], [], []>} : vector<8x8xbf16>, vector<8x64xbf16>, vector<8x64xf32> -> vector<8x64xf32>
    %7 = arith.addf %3, %6 : vector<8x64xf32>
    %8 = vector.extract_strided_slice %0 {offsets = [0, 0], sizes = [1, 64], strides = [1, 1]} : vector<4x64xf32> to vector<1x64xf32>
    %9 = vector.broadcast %8 : vector<1x64xf32> to vector<8x64xf32>
    %10 = arith.addf %7, %9 : vector<8x64xf32>
    %cst_10 = arith.constant 2.000000e+01 : f32
    %11 = vector.broadcast %cst_10 : f32 to vector<8x64xf32>
    %12 = arith.minimumf %10, %11 : vector<8x64xf32>
    %13 = math.exp %12 : vector<8x64xf32>
    %cst_11 = arith.constant 2.000000e+00 : f32
    %14 = vector.broadcast %cst_11 : f32 to vector<8x64xf32>
    %15 = arith.addf %13, %14 : vector<8x64xf32>
    %16 = arith.mulf %13, %15 : vector<8x64xf32>
    %cst_12 = arith.constant 2.000000e+00 : f32
    %17 = vector.broadcast %cst_12 : f32 to vector<8x64xf32>
    %18 = arith.addf %16, %17 : vector<8x64xf32>
    %19 = tpu.reciprocal %18 {approx = true} : vector<8x64xf32> -> vector<8x64xf32>
    %20 = arith.mulf %18, %19 : vector<8x64xf32>
    %cst_13 = arith.constant 2.000000e+00 : f32
    %21 = vector.broadcast %cst_13 : f32 to vector<8x64xf32>
    %22 = arith.subf %21, %20 : vector<8x64xf32>
    %23 = arith.mulf %19, %22 : vector<8x64xf32>
    %cst_14 = arith.constant 2.000000e+01 : f32
    %24 = vector.broadcast %cst_14 : f32 to vector<8x64xf32>
    %25 = arith.cmpf ogt, %10, %24 : vector<8x64xf32>
    %26 = arith.mulf %16, %23 : vector<8x64xf32>
    %27 = arith.mulf %10, %26 : vector<8x64xf32>
    %28 = arith.select %25, %10, %27 : vector<8x64xi1>, vector<8x64xf32>
    %29 = arith.truncf %28 : vector<8x64xf32> to vector<8x64xbf16>
    %c0_15 = arith.constant 0 : index
    %c0_16 = arith.constant 0 : index
    %30 = vector.load %arg5[%c0_15, %c0_16] : memref<64x64xbf16, #tpu.memory_space<vmem>>, vector<64x64xbf16>
    %cst_17 = arith.constant dense<0.000000e+00> : vector<8x64xf32>
    %31 = tpu.matmul %29, %30, %cst_17 {dimension_numbers = #tpu.dot_dimension_numbers<[1], [0], [0], [1], [0, 0, 1, 1], [], []>} : vector<8x64xbf16>, vector<64x64xbf16>, vector<8x64xf32> -> vector<8x64xf32>
    %32 = vector.extract_strided_slice %0 {offsets = [1, 0], sizes = [1, 64], strides = [1, 1]} : vector<4x64xf32> to vector<1x64xf32>
    %33 = vector.broadcast %32 : vector<1x64xf32> to vector<8x64xf32>
    %34 = arith.addf %31, %33 : vector<8x64xf32>
    %cst_18 = arith.constant 2.000000e+01 : f32
    %35 = vector.broadcast %cst_18 : f32 to vector<8x64xf32>
    %36 = arith.minimumf %34, %35 : vector<8x64xf32>
    %37 = math.exp %36 : vector<8x64xf32>
    %cst_19 = arith.constant 2.000000e+00 : f32
    %38 = vector.broadcast %cst_19 : f32 to vector<8x64xf32>
    %39 = arith.addf %37, %38 : vector<8x64xf32>
    %40 = arith.mulf %37, %39 : vector<8x64xf32>
    %cst_20 = arith.constant 2.000000e+00 : f32
    %41 = vector.broadcast %cst_20 : f32 to vector<8x64xf32>
    %42 = arith.addf %40, %41 : vector<8x64xf32>
    %43 = tpu.reciprocal %42 {approx = true} : vector<8x64xf32> -> vector<8x64xf32>
    %44 = arith.mulf %42, %43 : vector<8x64xf32>
    %cst_21 = arith.constant 2.000000e+00 : f32
    %45 = vector.broadcast %cst_21 : f32 to vector<8x64xf32>
    %46 = arith.subf %45, %44 : vector<8x64xf32>
    %47 = arith.mulf %43, %46 : vector<8x64xf32>
    %cst_22 = arith.constant 2.000000e+01 : f32
    %48 = vector.broadcast %cst_22 : f32 to vector<8x64xf32>
    %49 = arith.cmpf ogt, %34, %48 : vector<8x64xf32>
    %50 = arith.mulf %40, %47 : vector<8x64xf32>
    %51 = arith.mulf %34, %50 : vector<8x64xf32>
    %52 = arith.select %49, %34, %51 : vector<8x64xi1>, vector<8x64xf32>
    %53 = arith.truncf %52 : vector<8x64xf32> to vector<8x64xbf16>
    %c0_23 = arith.constant 0 : index
    %c0_24 = arith.constant 0 : index
    %54 = vector.load %arg6[%c0_23, %c0_24] : memref<64x64xbf16, #tpu.memory_space<vmem>>, vector<64x64xbf16>
    %cst_25 = arith.constant dense<0.000000e+00> : vector<8x64xf32>
    %55 = tpu.matmul %53, %54, %cst_25 {dimension_numbers = #tpu.dot_dimension_numbers<[1], [0], [0], [1], [0, 0, 1, 1], [], []>} : vector<8x64xbf16>, vector<64x64xbf16>, vector<8x64xf32> -> vector<8x64xf32>
    %56 = vector.extract_strided_slice %0 {offsets = [2, 0], sizes = [1, 64], strides = [1, 1]} : vector<4x64xf32> to vector<1x64xf32>
    %57 = vector.broadcast %56 : vector<1x64xf32> to vector<8x64xf32>
    %58 = arith.addf %55, %57 : vector<8x64xf32>
    %cst_26 = arith.constant 2.000000e+01 : f32
    %59 = vector.broadcast %cst_26 : f32 to vector<8x64xf32>
    %60 = arith.minimumf %58, %59 : vector<8x64xf32>
    %61 = math.exp %60 : vector<8x64xf32>
    %cst_27 = arith.constant 2.000000e+00 : f32
    %62 = vector.broadcast %cst_27 : f32 to vector<8x64xf32>
    %63 = arith.addf %61, %62 : vector<8x64xf32>
    %64 = arith.mulf %61, %63 : vector<8x64xf32>
    %cst_28 = arith.constant 2.000000e+00 : f32
    %65 = vector.broadcast %cst_28 : f32 to vector<8x64xf32>
    %66 = arith.addf %64, %65 : vector<8x64xf32>
    %67 = tpu.reciprocal %66 {approx = true} : vector<8x64xf32> -> vector<8x64xf32>
    %68 = arith.mulf %66, %67 : vector<8x64xf32>
    %cst_29 = arith.constant 2.000000e+00 : f32
    %69 = vector.broadcast %cst_29 : f32 to vector<8x64xf32>
    %70 = arith.subf %69, %68 : vector<8x64xf32>
    %71 = arith.mulf %67, %70 : vector<8x64xf32>
    %cst_30 = arith.constant 2.000000e+01 : f32
    %72 = vector.broadcast %cst_30 : f32 to vector<8x64xf32>
    %73 = arith.cmpf ogt, %58, %72 : vector<8x64xf32>
    %74 = arith.mulf %64, %71 : vector<8x64xf32>
    %75 = arith.mulf %58, %74 : vector<8x64xf32>
    %76 = arith.select %73, %58, %75 : vector<8x64xi1>, vector<8x64xf32>
    %77 = arith.truncf %76 : vector<8x64xf32> to vector<8x64xbf16>
    %c0_31 = arith.constant 0 : index
    %c0_32 = arith.constant 0 : index
    %78 = vector.load %arg7[%c0_31, %c0_32] : memref<64x2xbf16, #tpu.memory_space<vmem>>, vector<64x2xbf16>
    %cst_33 = arith.constant dense<0.000000e+00> : vector<8x2xf32>
    %79 = tpu.matmul %77, %78, %cst_33 {dimension_numbers = #tpu.dot_dimension_numbers<[1], [0], [0], [1], [0, 0, 1, 1], [], []>} : vector<8x64xbf16>, vector<64x2xbf16>, vector<8x2xf32> -> vector<8x2xf32>
    %80 = vector.extract_strided_slice %0 {offsets = [3, 0], sizes = [1, 2], strides = [1, 1]} : vector<4x64xf32> to vector<1x2xf32>
    %81 = vector.broadcast %80 : vector<1x2xf32> to vector<8x2xf32>
    %82 = arith.addf %79, %81 : vector<8x2xf32>
    %c0_34 = arith.constant 0 : index
    %c0_35 = arith.constant 0 : index
    %83 = vector.load %arg9[%c0_34, %c0_35] : memref<8x2xf32, #tpu.memory_space<vmem>>, vector<8x2xf32>
    tpu.vector_store %arg9[%c0_34, %c0_35], %82 {strides = array<i32>} : memref<8x2xf32, #tpu.memory_space<vmem>>, vector<8x2xf32>,
    return
  }
  func.func @transform_0(%arg0: i32) -> (i32, i32) {
    %c0_i32 = arith.constant 0 : i32
    %c0_i32_0 = arith.constant 0 : i32
    return %arg0, %c0_i32 : i32, i32
  }
  func.func @transform_1(%arg0: i32) -> (i32, i32) {
    %c0_i32 = arith.constant 0 : i32
    %c0_i32_0 = arith.constant 0 : i32
    return %arg0, %c0_i32 : i32, i32
  }
  func.func @transform_2(%arg0: i32) -> (i32, i32) {
    %c0_i32 = arith.constant 0 : i32
    %c0_i32_0 = arith.constant 0 : i32
    %c0_i32_1 = arith.constant 0 : i32
    return %c0_i32, %c0_i32_0 : i32, i32
  }
  func.func @transform_3(%arg0: i32) -> (i32, i32) {
    %c0_i32 = arith.constant 0 : i32
    %c0_i32_0 = arith.constant 0 : i32
    %c0_i32_1 = arith.constant 0 : i32
    return %c0_i32, %c0_i32_0 : i32, i32
  }
  func.func @transform_4(%arg0: i32) -> (i32, i32) {
    %c0_i32 = arith.constant 0 : i32
    %c0_i32_0 = arith.constant 0 : i32
    %c0_i32_1 = arith.constant 0 : i32
    return %c0_i32, %c0_i32_0 : i32, i32
  }
  func.func @transform_5(%arg0: i32) -> (i32, i32) {
    %c0_i32 = arith.constant 0 : i32
    %c0_i32_0 = arith.constant 0 : i32
    %c0_i32_1 = arith.constant 0 : i32
    return %c0_i32, %c0_i32_0 : i32, i32
  }
  func.func @transform_6(%arg0: i32) -> (i32, i32) {
    %c0_i32 = arith.constant 0 : i32
    %c0_i32_0 = arith.constant 0 : i32
    %c0_i32_1 = arith.constant 0 : i32
    return %c0_i32, %c0_i32_0 : i32, i32
  }
  func.func @transform_7(%arg0: i32) -> (i32, i32) {
    %c0_i32 = arith.constant 0 : i32
    %c0_i32_0 = arith.constant 0 : i32
    %c0_i32_1 = arith.constant 0 : i32
    return %c0_i32, %c0_i32_0 : i32, i32
  }
  func.func @transform_8(%arg0: i32) -> (i32, i32) {
    %c0_i32 = arith.constant 0 : i32
    %c0_i32_0 = arith.constant 0 : i32
    return %arg0, %c0_i32 : i32, i32
  }
}

</mosaic_0001>

<bundles_post_ra>
// kernel: critic_forward.1
= control target key start
LH: loop header
LB: loop body
LE: loop exit
PB: predicated region body
PF: predicated region fallthrough
CT: control target
= control target key end

     0   :  { %13 = vsyncpa [#allocation3], 0  ;;  %s793_s0 = inlined_call_operand.vmem [shape: bf16[8,16], index: 0, kind: input, shape index: {}]   ;;  %s794_s1 = inlined_call_operand.vmem [shape: bf16[8,8], index: 1, kind: input, shape index: {}]   ;;  %s795_s2 = inlined_call_operand.hbm [shape: bf16[16,64], index: 2, kind: input, shape index: {}]   ;;  %s796_s3 = inlined_call_operand.hbm [shape: bf16[8,64], index: 3, kind: input, shape index: {}]   ;;  %s797_s4 = inlined_call_operand.vmem [shape: bf16[64,64], index: 4, kind: input, shape index: {}]   ;;  %s798_s5 = inlined_call_operand.vmem [shape: bf16[64,64], index: 5, kind: input, shape index: {}]   ;;  %s799_s6 = inlined_call_operand.vmem [shape: bf16[64,2], index: 6, kind: input, shape index: {}]   ;;  %s800_s7 = inlined_call_operand.hbm [shape: f32[4,64], index: 7, kind: input, shape index: {}]   ;;  %s801_s8 = inlined_call_operand.vmem [shape: f32[8,2], index: 8, kind: output, shape index: {}]  }
   0x1   :  { %14 = vsyncpa [#allocation5], 0  ;;  %s648_s27 = smov [#allocation4]   ;;  %s649_s29 = smov [#allocation2]  }
   0x2   :  { %s37_s28 = sshll.u32 %s648_s27, 4  ;;  %s24_s30 = sshll.u32 %s649_s29, 4  ;;  %s38_s28 = int_to_ptr.vmem [resolvable:$true] %s37_s28  ;;  %s25_s30 = int_to_ptr.vmem [resolvable:$true] %s24_s30 }
   0x3   :  { %s592_s9 = scalar_lea.vmem %s38_s28, 64  ;;  %p597_p1 = scmp.lt.s32.totalorder %s38_s28, %s38_s28 }
   0x4   :  { %p593_p0 = scmp.ne.s32.totalorder %s38_s28, %s592_s9  ;;  %p598_p2 = scmp.lt.s32.totalorder %s592_s9, %s592_s9 }
   0x6   :  { %p599_p3 = por %p598_p2, %p597_p1 }
   0x8   :  { %p600_p4 = pnand %p599_p3, %p593_p0 }
   0xa   :  { %603 = shalt.err (!%p600_p4)
}
   0xb   :  { %40 = dma.hbm_to_vmem [thread:$0]  %s796_s3, 64, %s38_s28, [#allocation5]  }
   0xc   :  { %s612_s12 = scalar_lea.vmem %s25_s30, 128  ;;  %p617_p6 = scmp.lt.s32.totalorder %s25_s30, %s25_s30 }
   0xd   :  { %p613_p5 = scmp.ne.s32.totalorder %s25_s30, %s612_s12  ;;  %p618_p7 = scmp.lt.s32.totalorder %s612_s12, %s612_s12 }
   0xf   :  { %p619_p8 = por %p618_p7, %p617_p6 }
  0x11   :  { %p620_p9 = pnand %p619_p8, %p613_p5 }
  0x13   :  { %623 = shalt.err (!%p620_p9)
}
  0x14   :  { %s650_s13 = smov 64   ;;  %s651_s14 = smov 4  }
  0x15   :  { %30 = dma.hbm_to_vmem [thread:$0]  %s795_s2, 128, %s25_s30, [#allocation3], %s650_s13, %s650_s13, %s651_s14  }
  0x16   :  { %s652_s17 = smov [#allocation6]  }
  0x17   :  { %s53_s18 = sshll.u32 %s652_s17, 4  ;;  %s54_s18 = int_to_ptr.vmem [resolvable:$true] %s53_s18 }
  0x18   :  { %s632_s19 = scalar_lea.vmem %s54_s18, 64  ;;  %p637_p11 = scmp.lt.s32.totalorder %s54_s18, %s54_s18 }
  0x19   :  { %p633_p10 = scmp.ne.s32.totalorder %s54_s18, %s632_s19  ;;  %p638_p12 = scmp.lt.s32.totalorder %s632_s19, %s632_s19 }
  0x1b   :  { %p639_p13 = por %p638_p12, %p637_p11 }
  0x1d   :  { %p640_p0 = pnand %p639_p13, %p633_p10 }
  0x1f   :  { %643 = shalt.err (!%p640_p0)
}
  0x20   :  { %56 = dma.hbm_to_vmem [thread:$0]  %s800_s7, 64, %s54_s18, [#allocation5]  }
  0x21   :  { %644 = dma.done.wait [#allocation3], 128  }
  0x22   :  { %645 = vsyncadd [#allocation3], 4294967168 }
  0x23   :  { %646 = dma.done.wait [#allocation5], 128  }
  0x24   :  { %647 = vsyncadd [#allocation5], 4294967168  ;;  %v653_v0 = vmov 0.0   ;;  %vm654_vm0 = vmmov 0   ;;  %vm77_vm1 = vcmask 1043456   ;;  %vm73_vm2 = vcmask 64512  }
  0x25   :  { %504 = vmatprep.subr.bf16.mxu1 %v653_v0  ;;  %506 = vmatprep.mubr.msk.bf16.mxu1 %vm654_vm0, %v653_v0  ;;  %v72_v1 = vld [vmem:[#allocation4] sm:$0xf]  ;;  %v71_v3 = vld [vmem:[%s794_s1] sm:$0xf]  ;;  %vm127_vm3 = vcmask 130048   ;;  %v560_v6 = vld [vmem:[%s797_s4 + $0x18] sm:$0xff]   ;;  %v171_v10 = vlaneseq }
  0x26   :  { %516 = vmatprep.subr.bf16.mxu0 %v653_v0  ;;  %524 = vmatprep.mubr.msk.bf16.mxu0 %vm654_vm0, %v653_v0  ;;  %v79_v2 = vsel %vm77_vm1, %v72_v1, 0  ;;  %v559_v4 = vld [vmem:[#allocation2] sm:$0xff]   ;;  %v561_v7 = vld [vmem:[%s797_s4 + $0x10] sm:$0xff]   ;;  %v562_v8 = vld [vmem:[%s797_s4 + $0x8] sm:$0xff]   ;;  %vm227_vm5 = vcmask 523264   ;;  %vm459_vm8 = vcmask 15360  }
  0x27   :  { %505 = vmatpush3.bf16.msra.mxu1 %v79_v2  ;;  %v68_v5 = vld [vmem:[%s793_s0] sm:$0xf]  ;;  %517 = vmatpush3.bf16.msra.mxu0 %v560_v6  ;;  %v743_v11 = vshrl.u32 %v171_v10, 7  ;;  %v746_v16 = vld [vmem:[#allocation6] sm:$0xf]  ;;  %v564_v39 = vld [vmem:[%s798_s5 + $0x18] sm:$0xff]  }
  0x28   :  { %510 = vmatprep.subr.bf16.mxu1 %v653_v0  ;;  %518 = vmatprep.subr.bf16.mxu0 %v653_v0  ;;  %v563_v9 = vld [vmem:[%s797_s4] sm:$0xff]   ;;  %v565_v40 = vld [vmem:[%s798_s5 + $0x10] sm:$0xff]   ;;  %v566_v41 = vld [vmem:[%s798_s5 + $0x8] sm:$0xff]  }
  0x29   :  { %v173_v14 = vsub.s32 0, %v743_v11  ;;  %v567_v42 = vld [vmem:[%s798_s5] sm:$0xff]   ;;  %v201_v43 = vsub.s32 1, %v743_v11  ;;  %v568_v1 = vld [vmem:[%s799_s6 + $0x18] sm:$0xff]   ;;  %v569_v2 = vld [vmem:[%s799_s6 + $0x10] sm:$0xff]  }
  0x2a   :  { %507 = vmatmul.mubr.msk.bf16.vlgmr.msra.gmra.mxu1 %vm73_vm2, %v71_v3  ;;  %v570_v3 = vld [vmem:[%s799_s6 + $0x8] sm:$0xff]  }
  0x2b   :  { %511 = vmatpush3.bf16.msra.mxu1 %v559_v4  ;;  %512 = vmatprep.mubr.msk.bf16.mxu1 %vm654_vm0, %v653_v0  ;;  %v174_v18 = vrot.slane %v746_v16, %v173_v14  ;;  %v202_v44 = vrot.slane %v746_v16, %v201_v43  ;;  %v571_v4 = vld [vmem:[%s799_s6] sm:$0xff]  }
  0x2c   :  { %528 = vmatprep.subr.bf16.mxu1 %v653_v0  ;;  %519 = vmatpush3.bf16.msra.mxu0 %v561_v7 }
  0x2d   :  { %520 = vmatprep.subr.bf16.mxu0 %v653_v0 }
  0x30   :  { %521 = vmatpush3.bf16.msra.mxu0 %v562_v8 }
  0x31   :  { %522 = vmatprep.subr.bf16.mxu0 %v653_v0 }
  0x32   :  { %513 = vmatmul.mubr.msk.bf16.vlgmr.msra.gmra.mxu1 %vm127_vm3, %v68_v5  ;;  %v296_v5 = vsub.s32 2, %v743_v11 }
  0x33   :  { %536 = vmatprep.mubr.msk.bf16.mxu1 %vm654_vm0, %v653_v0  ;;  %529 = vmatpush3.bf16.msra.mxu1 %v564_v39 }
  0x34   :  { %523 = vmatpush3.bf16.msra.mxu0 %v563_v9  ;;  %530 = vmatprep.subr.bf16.mxu1 %v653_v0  ;;  %v297_v6 = vrot.slane %v746_v16, %v296_v5 }
  0x35   :  { %540 = vmatprep.subr.bf16.mxu0 %v653_v0 }
  0x37   :  { %531 = vmatpush3.bf16.msra.mxu1 %v565_v40 }
  0x38   :  { %532 = vmatprep.subr.bf16.mxu1 %v653_v0 }
  0x3b   :  { %533 = vmatpush3.bf16.msra.mxu1 %v566_v41 }
  0x3c   :  { %534 = vmatprep.subr.bf16.mxu1 %v653_v0 }
  0x3f   :  { %535 = vmatpush3.bf16.msra.mxu1 %v567_v42 }
  0xea   :  { %v115_v12 = vpop.f32.mrf.mxu1 }
  0xec   :  { %v508_v13 = vpop.f32.mrf.mxu1 }
  0xee   :  { %v118_v15 = vpop.f32.mrf.mxu1 }
  0xf0   :  { %v509_v17 = vpop.f32.mrf.mxu1 }
  0xf2   :  { %v165_v19 = vpop.f32.mrf.mxu1 }
  0xf3   :  { %v166_v20 = vadd.f32 %v165_v19, %v115_v12 }
  0xf4   :  { %v514_v21 = vpop.f32.mrf.mxu1 }
  0xf5   :  { %v175_v22 = vadd.f32 %v174_v18, %v166_v20 }
  0xf6   :  { %v168_v23 = vpop.f32.mrf.mxu1 }
  0xf7   :  { %v176_v24 = vmin.f32 %v175_v22, 20.0  ;;  %vm186_vm4 = vcmp.gt.f32.partialorder %v175_v22, 20.0 }
  0xf8   :  { %v515_v25 = vpop.f32.mrf.mxu1 }
  0xf9   :  { %v177_v26 = vmul.f32 1.442695, %v176_v24 }
  0xfb   :  { %572 = vpow2.f32 %v177_v26 }
 0x108   :  { %v573_v27 = vpop.eup %572 }
 0x109   :  { %v179_v28 = vadd.f32 2.0, %v573_v27 }
 0x10b   :  { %v180_v29 = vmul.f32 %v573_v27, %v179_v28  ;;  %v390_v27 = vsub.s32 3, %v743_v11 }
 0x10d   :  { %v181_v30 = vadd.f32 2.0, %v180_v29  ;;  %v391_v28 = vrot.slane %v746_v16, %v390_v27 }
 0x10f   :  { %574 = vrcp.f32 %v181_v30 }
 0x11c   :  { %v575_v31 = vpop.eup %574 }
 0x11d   :  { %v183_v32 = vmul.f32 %v575_v31, %v181_v30 }
 0x11f   :  { %v184_v33 = vsub.f32 2.0, %v183_v32 }
 0x121   :  { %v185_v34 = vmul.f32 %v575_v31, %v184_v33 }
 0x123   :  { %v187_v35 = vmul.f32 %v185_v34, %v180_v29 }
 0x125   :  { %v188_v36 = vmul.f32 %v187_v35, %v175_v22 }
 0x127   :  { %v189_v37 = vsel %vm186_vm4, %v175_v22, %v188_v36 }
 0x128   :  { %v190_v38 = vpack.c.bf16 %v189_v37, %v189_v37 }
 0x12a   :  { %525 = vmatmul.mubr.msk.bf16.vlgmr.msra.gmra.mxu0 %vm227_vm5, %v190_v38 }
 0x12b   :  { %548 = vmatprep.mubr.msk.bf16.mxu0 %vm654_vm0, %v653_v0  ;;  %541 = vmatpush3.bf16.msra.mxu0 %v568_v1 }
 0x12c   :  { %542 = vmatprep.subr.bf16.mxu0 %v653_v0 }
 0x12f   :  { %543 = vmatpush3.bf16.msra.mxu0 %v569_v2 }
 0x130   :  { %544 = vmatprep.subr.bf16.mxu0 %v653_v0 }
 0x133   :  { %545 = vmatpush3.bf16.msra.mxu0 %v570_v3 }
 0x134   :  { %546 = vmatprep.subr.bf16.mxu0 %v653_v0 }
 0x137   :  { %547 = vmatpush3.bf16.msra.mxu0 %v571_v4 }
 0x1ea   :  { %v265_v45 = vpop.f32.mrf.mxu0 }
 0x1eb   :  { %v266_v46 = vadd.f32 %v265_v45, %v202_v44 }
 0x1ec   :  { %v526_v47 = vpop.f32.mrf.mxu0 }
 0x1ed   :  { %v271_v48 = vmin.f32 %v266_v46, 20.0  ;;  %vm281_vm6 = vcmp.gt.f32.partialorder %v266_v46, 20.0 }
 0x1ee   :  { %v268_v49 = vpop.f32.mrf.mxu0 }
 0x1ef   :  { %v272_v50 = vmul.f32 1.442695, %v271_v48 }
 0x1f0   :  { %v527_v51 = vpop.f32.mrf.mxu0 }
 0x1f1   :  { %576 = vpow2.f32 %v272_v50 }
 0x1fe   :  { %v577_v52 = vpop.eup %576 }
 0x1ff   :  { %v274_v53 = vadd.f32 2.0, %v577_v52 }
 0x201   :  { %v275_v54 = vmul.f32 %v577_v52, %v274_v53 }
 0x203   :  { %v276_v55 = vadd.f32 2.0, %v275_v54 }
 0x205   :  { %578 = vrcp.f32 %v276_v55 }
 0x212   :  { %v579_v56 = vpop.eup %578 }
 0x213   :  { %v278_v57 = vmul.f32 %v579_v56, %v276_v55 }
 0x215   :  { %v279_v58 = vsub.f32 2.0, %v278_v57 }
 0x217   :  { %v280_v59 = vmul.f32 %v579_v56, %v279_v58 }
 0x219   :  { %v282_v60 = vmul.f32 %v280_v59, %v275_v54 }
 0x21b   :  { %v283_v61 = vmul.f32 %v282_v60, %v266_v46 }
 0x21d   :  { %v284_v62 = vsel %vm281_vm6, %v266_v46, %v283_v61 }
 0x21e   :  { %v285_v63 = vpack.c.bf16 %v284_v62, %v284_v62 }
 0x220   :  { %537 = vmatmul.mubr.msk.bf16.vlgmr.msra.gmra.mxu1 %vm227_vm5, %v285_v63 }
 0x2e0   :  { %v359_v7 = vpop.f32.mrf.mxu1 }
 0x2e1   :  { %v360_v8 = vadd.f32 %v359_v7, %v297_v6 }
 0x2e2   :  { %v538_v9 = vpop.f32.mrf.mxu1 }
 0x2e3   :  { %v365_v10 = vmin.f32 %v360_v8, 20.0  ;;  %vm375_vm7 = vcmp.gt.f32.partialorder %v360_v8, 20.0 }
 0x2e4   :  { %v362_v12 = vpop.f32.mrf.mxu1 }
 0x2e5   :  { %v366_v13 = vmul.f32 1.442695, %v365_v10 }
 0x2e6   :  { %v539_v14 = vpop.f32.mrf.mxu1 }
 0x2e7   :  { %580 = vpow2.f32 %v366_v13 }
 0x2f4   :  { %v581_v15 = vpop.eup %580 }
 0x2f5   :  { %v368_v17 = vadd.f32 2.0, %v581_v15 }
 0x2f7   :  { %v369_v0 = vmul.f32 %v581_v15, %v368_v17 }
 0x2f9   :  { %v370_v18 = vadd.f32 2.0, %v369_v0 }
 0x2fb   :  { %582 = vrcp.f32 %v370_v18 }
 0x308   :  { %v583_v19 = vpop.eup %582 }
 0x309   :  { %v372_v20 = vmul.f32 %v583_v19, %v370_v18 }
 0x30b   :  { %v373_v21 = vsub.f32 2.0, %v372_v20 }
 0x30d   :  { %v374_v22 = vmul.f32 %v583_v19, %v373_v21 }
 0x30f   :  { %v376_v23 = vmul.f32 %v374_v22, %v369_v0 }
 0x311   :  { %v377_v24 = vmul.f32 %v376_v23, %v360_v8 }
 0x313   :  { %v378_v25 = vsel %vm375_vm7, %v360_v8, %v377_v24 }
 0x314   :  { %v379_v26 = vpack.c.bf16 %v378_v25, %v378_v25 }
 0x316   :  { %549 = vmatmul.mubr.msk.bf16.vlgmr.msra.gmra.mxu0 %vm227_vm5, %v379_v26 }
 0x3d6   :  { %v453_v29 = vpop.f32.mrf.mxu0 }
 0x3d7   :  { %v454_v30 = vadd.f32 %v453_v29, %v391_v28 }
 0x3d8   :  { %v550_v31 = vpop.f32.mrf.mxu0 }
 0x3d9   :  { %460 = vst.msk [vmem:[%s801_s8] sm:$0xff] %vm459_vm8, %v454_v30 }
 0x3da   :  { %v456_v32 = vpop.f32.mrf.mxu0 }
 0x3dc   :  { %v551_v33 = vpop.f32.mrf.mxu0 }
 0x3dd   :  { %465 = vsyncpa [#allocation3], 1 }
 0x3de   :  { %466 = vsyncpa [#allocation5], 1 }

</bundles_post_ra>
